<compile_context>
chip_gen: v7x
topology: tpu7x:2x2x1
jax: 0.10.0
libtpu: 0.0.40
codegen_flags: <defaults>
</compile_context>

<pallas_src>
import jax
import jax.numpy as jnp
from jax.experimental import pallas as pl
from jax.experimental.pallas import tpu as pltpu

GN_EPS = 1e-5  # nn.GroupNorm default eps (the module's forward `eps` arg is unused)


# --------------------------------------------------------------------------
# Stage 1: batch-invariant skinning MLP  (seg_code -> skinning weights)
# --------------------------------------------------------------------------
def _skinning_mlp_kernel(seg_ref, sw1_ref, sw2_ref, sw3_ref, skin_ref):
    """skin_w = W3 @ relu(W2 @ relu(W1 @ seg)) for one V-tile."""
    f32, bf16 = jnp.float32, jnp.bfloat16
    relu = lambda t: jnp.maximum(t, 0.0)

    def mxu(a, b):
        return jnp.dot(a.astype(bf16), b.astype(bf16), preferred_element_type=f32)

    h = relu(mxu(seg_ref[...], sw1_ref[...]))
    h = relu(mxu(h, sw2_ref[...]))
    skin_ref[...] = mxu(h, sw3_ref[...]).astype(skin_ref.dtype)


def _pick_v_tile(V):
    for t in (512, 256, 128, 64, 32, 16, 8):
        if V % t == 0:
            return t
    return V


def skinning_mlp(seg, sw1, sw2, sw3):
    """seg: [V, S] f32 -> skin_w: [V, E] bf16.  Run once; shared across batch."""
    V, S = seg.shape
    H = sw1.shape[-1]
    E = sw3.shape[-1]
    tv = _pick_v_tile(V)
    return pl.pallas_call(
        _skinning_mlp_kernel,
        out_shape=jax.ShapeDtypeStruct((V, E), jnp.bfloat16),
        grid=(V // tv,),
        in_specs=[
            pl.BlockSpec((tv, S), lambda i: (i, 0)),
            pl.BlockSpec((S, H), lambda i: (0, 0)),
            pl.BlockSpec((H, H), lambda i: (0, 0)),
            pl.BlockSpec((H, E), lambda i: (0, 0)),
        ],
        out_specs=pl.BlockSpec((tv, E), lambda i: (i, 0)),
        compiler_params=pltpu.CompilerParams(dimension_semantics=("parallel",)),
    )(seg, sw1, sw2, sw3)


# --------------------------------------------------------------------------
# Stage 2: per-instance decoder stack
# --------------------------------------------------------------------------
def skinning_decoder_kernel(
    x_ref,      # [V, C]      f32
    exp_ref,    # [E, 1]      f32  per-instance expression code (column)
    id_ref,     # [1, ID]     f32  per-instance id code (rank-1, not V-broadcast)
    skin_ref,   # [V, E]      bf16 precomputed skinning weights (batch invariant)
    w0x_ref,    # [C, H]      bf16 first linear, x block
    w0e_ref,    # [E, H]      bf16 first linear, focused-exp block
    w0i_ref,    # [ID, H]     bf16 first linear, id block
    lw_ref,     # [L, H, H]   bf16 hidden linears
    gamma_ref,  # [L+1, 1, H] f32  GroupNorm weight
    beta_ref,   # [L+1, 1, H] f32  GroupNorm bias
    p_ref,      # [H, H]      f32  block-diagonal group-averaging matrix
    ow_ref,     # [H, OP]     bf16 output linear weight (lane-padded)
    ob_ref,     # [1, OP]     f32  output linear bias (lane-padded)
    o_ref,      # [V, OP]     f32  output
):
    f32, bf16 = jnp.float32, jnp.bfloat16
    relu = lambda t: jnp.maximum(t, 0.0)

    V = x_ref.shape[0]
    inv_V = 1.0 / float(V)   # NOTE: must stay the FULL vertex count if V is ever tiled
    p_avg = p_ref[...]       # 1/(H/G) within each channel group, else 0

    def mxu(a, b):
        # bf16 MXU datapath, f32 accumulation.  astype is a no-op for bf16 inputs.
        return jnp.dot(a.astype(bf16), b.astype(bf16), preferred_element_type=f32)

    def gn_act(tmp, gamma, beta):
        # GroupNorm over (channels-in-group x V) + folded affine + ReLU.
        # One [2,H]@[H,H] dot aggregates per-group sum / sum-of-squares and
        # broadcasts them back per channel.  Stats / rsqrt stay f32; the bf16
        # downcast is fused into the layer epilogue so the next matmul needs no
        # separate V x H cast pass.
        ch_sum = jnp.sum(tmp, axis=0, keepdims=True)               # [1, H]
        ch_sq = jnp.sum(tmp * tmp, axis=0, keepdims=True)          # [1, H]
        stats = jnp.concatenate([ch_sum, ch_sq], axis=0)           # [2, H]
        agg = jnp.dot(stats, p_avg, preferred_element_type=f32) * inv_V
        mean_c = agg[0:1]
        # TODO(synk): one-pass E[x^2]-mean^2 variance; acceptable under the
        # documented bf16 tolerance gate in __main__, switch to two-pass
        # (subtract-mean) if tolerance requirements tighten.
        var_c = agg[1:2] - mean_c * mean_c
        scale = jax.lax.rsqrt(var_c + GN_EPS) * gamma              # fold affine
        shift = beta - mean_c * scale
        return relu(tmp * scale + shift).astype(bf16)              # fused downcast

    # Fold exp into the first-linear weight block instead of scaling a [V, E]
    # activation slab: [E,1] * [E,H], once per instance.
    w0e_scaled = (exp_ref[...] * w0e_ref[...].astype(f32)).astype(bf16)
    # id is constant over V -> rank-1 bias from one [1,ID]@[ID,H] matmul.
    id_bias = mxu(id_ref[...], w0i_ref[...])                       # [1, H]

    # ---- first linear: cat([x, focused_exp, id]) @ W0 as split matmuls ----
    tmp = mxu(x_ref[...], w0x_ref[...]) + mxu(skin_ref[...], w0e_scaled) + id_bias
    out = gn_act(tmp, gamma_ref[0], beta_ref[0])

    # ---- hidden linears (static unroll over small num_layer) ----
    for i in range(lw_ref.shape[0]):
        out = gn_act(mxu(out, lw_ref[i]), gamma_ref[i + 1], beta_ref[i + 1])

    # ---- output linear (bias), lane-dense OP-wide store (unmasked vst) ----
    o_ref[...] = mxu(out, ow_ref[...]) + ob_ref[...]


def skinning_decoder_forward(x, exp_code, id_code, seg_code, params):
    """x: [B,V,C], exp_code: [B,E], id_code: [B,1,ID], seg_code: [1,V,S] -> [B,V,O]."""
    B, V, C = x.shape
    E = exp_code.shape[-1]
    ID = id_code.shape[-1]
    H = params["w0x"].shape[-1]
    L = params["lw"].shape[0]
    OP = params["out_w_pad"].shape[-1]
    O = params["out_b"].shape[-1]

    # Stage 1: batch-invariant skinning MLP (seg_code shared across instances).
    skin_w = skinning_mlp(seg_code[0], params["sw1"], params["sw2"], params["sw3"])

    exp_col = exp_code.reshape(B, E, 1)   # [E,1] per instance: folds into w0e rows

    operands = (
        x, exp_col, id_code, skin_w,
        params["w0x"], params["w0e"], params["w0i"],
        params["lw"], params["gamma"], params["beta"], params["p_avg"],
        params["out_w_pad"], params["out_b_pad"],
    )

    const2 = lambda b: (0, 0)
    const3 = lambda b: (0, 0, 0)
    in_specs = [
        pl.BlockSpec((None, V, C), lambda b: (b, 0, 0)),   # x        -> [V, C]
        pl.BlockSpec((None, E, 1), lambda b: (b, 0, 0)),   # exp col  -> [E, 1]
        pl.BlockSpec((None, 1, ID), lambda b: (b, 0, 0)),  # id row   -> [1, ID]
        pl.BlockSpec((V, E), const2),                      # skin_w (shared)
        pl.BlockSpec((C, H), const2),                      # w0x (resident)
        pl.BlockSpec((E, H), const2),                      # w0e
        pl.BlockSpec((ID, H), const2),                     # w0i
        pl.BlockSpec((L, H, H), const3),                   # lw
        pl.BlockSpec((L + 1, 1, H), const3),               # gamma
        pl.BlockSpec((L + 1, 1, H), const3),               # beta
        pl.BlockSpec((H, H), const2),                      # p_avg
        pl.BlockSpec((H, OP), const2),                     # out_w (lane-padded)
        pl.BlockSpec((1, OP), const2),                     # out_b (lane-padded)
    ]
    out_spec = pl.BlockSpec((None, V, OP), lambda b: (b, 0, 0))

    flops = B * (
        2 * V * H * (C + E)                          # first linear (x + exp blocks)
        + 2 * ID * H + E * H                         # rank-1 id bias + exp weight fold
        + 2 * L * V * H * H                          # hidden linears
        + 2 * V * H * OP                             # padded output linear
        + (L + 1) * (2 * 2 * H * H + 8 * V * H)      # GN stats agg + epilogue
    )
    bytes_accessed = sum(int(a.nbytes) for a in operands) + B * V * OP * 4

    # VMEM budget from the actual working set, clamped against physical VMEM
    # (64 MiB on v7x vs 128 MiB on v5e/v6e); monolithic-V GN assumed to fit.
    resident = sum(int(a.nbytes) for a in operands[3:]) + int(skin_w.nbytes)
    per_step = V * C * 4 + E * 4 + ID * 4 + V * OP * 4
    acts = 3 * V * H * 4 + V * H * 2
    budget = 2 * (resident + per_step) + acts + (4 << 20)
    try:
        phys_vmem = int(pltpu.get_tpu_info().vmem_capacity_bytes)
    except Exception:
        phys_vmem = 64 << 20
    vmem_limit = int(min(max(budget, 32 << 20), int(phys_vmem * 0.8)))

    out = pl.pallas_call(
        skinning_decoder_kernel,
        out_shape=jax.ShapeDtypeStruct((B, V, OP), jnp.float32),
        grid=(B,),
        in_specs=in_specs,
        out_specs=out_spec,
        compiler_params=pltpu.CompilerParams(
            dimension_semantics=("parallel",),
            vmem_limit_bytes=vmem_limit,
        ),
        cost_estimate=pl.CostEstimate(
            flops=int(flops),
            transcendentals=int(B * (L + 1) * H),
            bytes_accessed=int(bytes_accessed),
        ),
    )(*operands)
    return out[..., :O]   # drop the zero lane padding


# --------------------------------------------------------------------------
# Params + pure-JAX reference
# --------------------------------------------------------------------------
def init_params(key, in_dim, id_dim, exp_dim, seg_dim, hid_dim, num_layer,
                num_gn, out_shape):
    ks = iter(jax.random.split(key, 16 + num_layer))

    def lin_w(k, fan_in, fan_out):
        bound = 1.0 / (fan_in ** 0.5)
        w = jax.random.uniform(k, (fan_in, fan_out), jnp.float32, -bound, bound)
        # bf16 master copies: kernel and f32 reference share identical values.
        return w.astype(jnp.bfloat16)

    cat_dim = in_dim + exp_dim + id_dim
    w0 = lin_w(next(ks), cat_dim, hid_dim)
    lw = jnp.stack([lin_w(next(ks), hid_dim, hid_dim) for _ in range(num_layer)], 0)
    # torch default GN init is weight=1/bias=0; perturb so the affine is exercised.
    gamma = 1.0 + 0.1 * jax.random.normal(next(ks), (num_layer + 1, 1, hid_dim), jnp.float32)
    beta = 0.1 * jax.random.normal(next(ks), (num_layer + 1, 1, hid_dim), jnp.float32)
    sw1 = lin_w(next(ks), seg_dim, hid_dim)
    sw2 = lin_w(next(ks), hid_dim, hid_dim)
    sw3 = lin_w(next(ks), hid_dim, exp_dim)
    out_w = lin_w(next(ks), hid_dim, out_shape)
    bound = 1.0 / (hid_dim ** 0.5)
    out_b = jax.random.uniform(next(ks), (1, out_shape), jnp.float32, -bound, bound)

    # Lane-dense (padded to a multiple of 128) output weight/bias for the kernel.
    op = ((out_shape + 127) // 128) * 128
    out_w_pad = jnp.zeros((hid_dim, op), jnp.bfloat16).at[:, :out_shape].set(out_w)
    out_b_pad = jnp.zeros((1, op), jnp.float32).at[:, :out_shape].set(out_b)

    # Block-diagonal group-averaging matrix (1/group_size within each channel
    # group); the kernel multiplies the remaining 1/V at trace time.
    hg = hid_dim // num_gn
    ch = jnp.arange(hid_dim)
    gm = (ch[:, None] // hg == jnp.arange(num_gn)[None, :]).astype(jnp.float32)
    p_avg = (gm @ gm.T) / float(hg)

    return dict(
        w0x=w0[:in_dim], w0e=w0[in_dim:in_dim + exp_dim], w0i=w0[in_dim + exp_dim:],
        w0_full=w0,  # only used by the pure-JAX reference
        lw=lw, gamma=gamma, beta=beta,
        sw1=sw1, sw2=sw2, sw3=sw3,
        out_w=out_w, out_b=out_b, out_w_pad=out_w_pad, out_b_pad=out_b_pad,
        p_avg=p_avg,
    )


def reference_forward(x, exp_code, id_code, seg_code, params, num_gn):
    """Pure-JAX f32 reference mirroring the PyTorch forward (same bf16 weight
    values upcast to f32, so only the kernel's activation rounding differs).
    id_code [B,1,ID] is broadcast over V before the concat, matching the
    module's evident intent (batch=1 / single-row id)."""
    relu = lambda t: jnp.maximum(t, 0.0)
    hp = jax.lax.Precision.HIGHEST
    f32 = jnp.float32
    dot = lambda a, b: jnp.matmul(a.astype(f32), b.astype(f32), precision=hp)

    B, V, _ = x.shape
    h = relu(dot(seg_code, params["sw1"]))
    h = relu(dot(h, params["sw2"]))
    skin_w = dot(h, params["sw3"])                         # [1, V, E]
    focused = skin_w * exp_code[:, None, :]                # [B, V, E]
    idb = jnp.broadcast_to(id_code, (B, V, id_code.shape[-1]))
    out = jnp.concatenate([x, focused, idb], axis=-1)

    weights = [params["w0_full"]] + [params["lw"][i] for i in range(params["lw"].shape[0])]
    for i, w in enumerate(weights):
        tmp = dot(out, w)                                  # [B, V, H]
        H = tmp.shape[-1]
        t = jnp.transpose(tmp, (0, 2, 1))                  # [B, H, V]
        tg = t.reshape(B, num_gn, -1)
        mean = tg.mean(axis=-1, keepdims=True)
        var = tg.var(axis=-1, keepdims=True)
        tg = (tg - mean) / jnp.sqrt(var + GN_EPS)
        t = tg.reshape(B, H, V)
        gamma = params["gamma"][i].reshape(1, H, 1)
        beta = params["beta"][i].reshape(1, H, 1)
        out = jnp.transpose(relu(t * gamma + beta), (0, 2, 1))
    return dot(out, params["out_w"]) + params["out_b"]


if __name__ == "__main__":
    # Small shapes consistent with the module's forward semantics.
    B, V = 2, 384
    in_dim, exp_dim, id_dim, seg_dim = 16, 32, 16, 20
    hid_dim, num_layer, num_gn, out_shape = 128, 3, 8, 9

    key = jax.random.PRNGKey(0)
    kx, ke, ki, ks, kp = jax.random.split(key, 5)
    x = jax.random.normal(kx, (B, V, in_dim), jnp.float32)
    exp_code = jax.random.normal(ke, (B, exp_dim), jnp.float32)
    id_code = jax.random.normal(ki, (B, 1, id_dim), jnp.float32)
    seg_code = jax.random.normal(ks, (1, V, seg_dim), jnp.float32)

    params = init_params(kp, in_dim, id_dim, exp_dim, seg_dim, hid_dim,
                         num_layer, num_gn, out_shape)

    out = skinning_decoder_forward(x, exp_code, id_code, seg_code, params)
    out = jax.block_until_ready(out)
    assert out.shape == (B, V, out_shape), out.shape

    ref = reference_forward(x, exp_code, id_code, seg_code, params, num_gn)
    max_err = float(jnp.max(jnp.abs(out - ref)))
    # Tolerance gate: bf16 MXU inputs + one-pass GN variance are deliberate
    # numerics changes vs. the f32 reference (which shares the same bf16 weight
    # values), so only activation rounding differs.
    assert max_err < 2e-1, f"kernel/reference mismatch: max abs err {max_err}"

    print("KERNEL_OK")
</pallas_src>

<mosaic_0001>
module attributes {stable_mosaic.version = 11 : i64} {
  func.func @_skinning_mlp_kernel(%arg0: i32, %arg1: memref<128x20xf32, #tpu.memory_space<vmem>>, %arg2: memref<20x128xbf16, #tpu.memory_space<vmem>>, %arg3: memref<128x128xbf16, #tpu.memory_space<vmem>>, %arg4: memref<128x32xbf16, #tpu.memory_space<vmem>>, %arg5: memref<128x32xbf16, #tpu.memory_space<vmem>>) attributes {dimension_semantics = [#tpu.dimension_semantics<parallel>], iteration_bounds = array<i64: 3>, scalar_prefetch = 0 : i64, scratch_operands = 0 : i64, tpu.core_type = #tpu.core_type<tc>, window_params = [{transform_indices = @transform_0, window_bounds = array<i64: 128, 20>}, {pipeline_mode = #tpu.pipeline_mode<synchronous>, transform_indices = @transform_1, window_bounds = array<i64: 20, 128>}, {pipeline_mode = #tpu.pipeline_mode<synchronous>, transform_indices = @transform_2, window_bounds = array<i64: 128, 128>}, {pipeline_mode = #tpu.pipeline_mode<synchronous>, transform_indices = @transform_3, window_bounds = array<i64: 128, 32>}, {transform_indices = @transform_4, window_bounds = array<i64: 128, 32>}]} {
    %c0 = arith.constant 0 : index
    %c0_0 = arith.constant 0 : index
    %0 = vector.load %arg1[%c0, %c0_0] : memref<128x20xf32, #tpu.memory_space<vmem>>, vector<128x20xf32>
    %c0_1 = arith.constant 0 : index
    %c0_2 = arith.constant 0 : index
    %1 = vector.load %arg2[%c0_1, %c0_2] : memref<20x128xbf16, #tpu.memory_space<vmem>>, vector<20x128xbf16>
    %2 = arith.truncf %0 : vector<128x20xf32> to vector<128x20xbf16>
    %cst = arith.constant dense<0.000000e+00> : vector<128x128xf32>
    %3 = tpu.matmul %2, %1, %cst {dimension_numbers = #tpu.dot_dimension_numbers<[1], [0], [0], [1], [0, 0, 1, 1], [], []>} : vector<128x20xbf16>, vector<20x128xbf16>, vector<128x128xf32> -> vector<128x128xf32>
    %cst_3 = arith.constant 0.000000e+00 : f32
    %4 = vector.broadcast %cst_3 : f32 to vector<128x128xf32>
    %5 = arith.maximumf %3, %4 : vector<128x128xf32>
    %c0_4 = arith.constant 0 : index
    %c0_5 = arith.constant 0 : index
    %6 = vector.load %arg3[%c0_4, %c0_5] : memref<128x128xbf16, #tpu.memory_space<vmem>>, vector<128x128xbf16>
    %7 = arith.truncf %5 : vector<128x128xf32> to vector<128x128xbf16>
    %cst_6 = arith.constant dense<0.000000e+00> : vector<128x128xf32>
    %8 = tpu.matmul %7, %6, %cst_6 {dimension_numbers = #tpu.dot_dimension_numbers<[1], [0], [0], [1], [0, 0, 1, 1], [], []>} : vector<128x128xbf16>, vector<128x128xbf16>, vector<128x128xf32> -> vector<128x128xf32>
    %cst_7 = arith.constant 0.000000e+00 : f32
    %9 = vector.broadcast %cst_7 : f32 to vector<128x128xf32>
    %10 = arith.maximumf %8, %9 : vector<128x128xf32>
    %c0_8 = arith.constant 0 : index
    %c0_9 = arith.constant 0 : index
    %11 = vector.load %arg4[%c0_8, %c0_9] : memref<128x32xbf16, #tpu.memory_space<vmem>>, vector<128x32xbf16>
    %12 = arith.truncf %10 : vector<128x128xf32> to vector<128x128xbf16>
    %cst_10 = arith.constant dense<0.000000e+00> : vector<128x32xf32>
    %13 = tpu.matmul %12, %11, %cst_10 {dimension_numbers = #tpu.dot_dimension_numbers<[1], [0], [0], [1], [0, 0, 1, 1], [], []>} : vector<128x128xbf16>, vector<128x32xbf16>, vector<128x32xf32> -> vector<128x32xf32>
    %14 = arith.truncf %13 : vector<128x32xf32> to vector<128x32xbf16>
    %c0_11 = arith.constant 0 : index
    %c0_12 = arith.constant 0 : index
    %15 = vector.load %arg5[%c0_11, %c0_12] : memref<128x32xbf16, #tpu.memory_space<vmem>>, vector<128x32xbf16>
    tpu.vector_store %arg5[%c0_11, %c0_12], %14 {strides = array<i32>} : memref<128x32xbf16, #tpu.memory_space<vmem>>, vector<128x32xbf16>,
    return
  }
  func.func @transform_0(%arg0: i32) -> (i32, i32) {
    %c0_i32 = arith.constant 0 : i32
    %c0_i32_0 = arith.constant 0 : i32
    return %arg0, %c0_i32 : i32, i32
  }
  func.func @transform_1(%arg0: i32) -> (i32, i32) {
    %c0_i32 = arith.constant 0 : i32
    %c0_i32_0 = arith.constant 0 : i32
    %c0_i32_1 = arith.constant 0 : i32
    return %c0_i32, %c0_i32_0 : i32, i32
  }
  func.func @transform_2(%arg0: i32) -> (i32, i32) {
    %c0_i32 = arith.constant 0 : i32
    %c0_i32_0 = arith.constant 0 : i32
    %c0_i32_1 = arith.constant 0 : i32
    return %c0_i32, %c0_i32_0 : i32, i32
  }
  func.func @transform_3(%arg0: i32) -> (i32, i32) {
    %c0_i32 = arith.constant 0 : i32
    %c0_i32_0 = arith.constant 0 : i32
    %c0_i32_1 = arith.constant 0 : i32
    return %c0_i32, %c0_i32_0 : i32, i32
  }
  func.func @transform_4(%arg0: i32) -> (i32, i32) {
    %c0_i32 = arith.constant 0 : i32
    %c0_i32_0 = arith.constant 0 : i32
    return %arg0, %c0_i32 : i32, i32
  }
}

</mosaic_0001>

<bundles_post_ra>
// kernel: tpu_custom_call.1
= control target key start
LH: loop header
LB: loop body
LE: loop exit
PB: predicated region body
PF: predicated region fallthrough
CT: control target
= control target key end

     0   :  { %s1126_s15 = smov 0   ;;  %s1261_s0 = inlined_call_operand.vmem [shape: f32[384,20], index: 0, kind: input, shape index: {}]   ;;  %s1262_s1 = inlined_call_operand.vmem [shape: bf16[20,128], index: 1, kind: input, shape index: {}]   ;;  %s1263_s2 = inlined_call_operand.vmem [shape: bf16[128,128], index: 2, kind: input, shape index: {}]   ;;  %s1264_s3 = inlined_call_operand.vmem [shape: bf16[128,32], index: 3, kind: input, shape index: {}]   ;;  %s1265_s4 = inlined_call_operand.vmem [shape: bf16[384,32], index: 4, kind: output, shape index: {}]  }
   0x1 LB: > { %s871_s16 = sadd.s32 4294967295, %s1099_s15   ;;  %p875_p0 = scmp.ge.s32.totalorder %s1099_s15, 1  ;;  %s1099_s15 = sphi %s1126_s15, %s14_s15  }
   0x2   : > { %p163_p1 = scmp.lt.s32.totalorder %s1099_s15, 4 }
   0x4   : > { %p164_p2 = pnand %p875_p0, %p163_p1 }
   0x5   : > { %v1075_v0 = vld [vmem:[%s1262_s1] sm:$0xff] (!%p164_p2)   ;;  %vm263_vm0 = vcmask (!%p164_p2), 1041408   ;;  %v1076_v1 = vld [vmem:[%s1262_s1 + $0x8] ss:$0 sps:$4 sm:$0x33] (!%p164_p2)   ;;  %s876_s21 = sshll.u32 (!%p164_p2), %s871_s16, 4 }
   0x6   : > { %167 = sbr.rel (%p164_p2) target bundleno = 702 (0x2be), region = 36  ;;  %982 = vmatprep.subr.bf16.mxu0 (!%p164_p2), %v1075_v0  ;;  %p190_p3 = scmp.lt.s32.totalorder (!%p164_p2), %s876_s21, 47  ;;  %v265_v2 = vsel (!%p164_p2), %vm263_vm0, %v1076_v1, 0  ;;  %v1077_v3 = vld [vmem:[%s1263_s2] sm:$0xff] (!%p164_p2)   ;;  %v1078_v4 = vld [vmem:[%s1263_s2 + $0x8] sm:$0xff] (!%p164_p2)   ;;  %v1079_v5 = vld [vmem:[%s1263_s2 + $0x10] sm:$0xff] (!%p164_p2)  }
   0x7   : > { %983 = vmatpush3.bf16.msra.mxu0 (!%p164_p2), %v1075_v0  ;;  %1002 = vmatprep.subr.bf16.mxu1 (!%p164_p2), %v1077_v3  ;;  %vm238_vm1 = vcmask (!%p164_p2), 162816   ;;  %v1080_v15 = vld [vmem:[%s1263_s2 + $0x18] sm:$0xff] (!%p164_p2)   ;;  %v1081_v20 = vld [vmem:[%s1263_s2 + $0x20] sm:$0xff] (!%p164_p2)   ;;  %v1082_v23 = vld [vmem:[%s1263_s2 + $0x28] sm:$0xff] (!%p164_p2)   ;;  %vm798_vm2 = vcmask (!%p164_p2), 257024  }
   0x8   : > { %1066 = vmatprep.subr.msk.bf16.mxu0 (!%p164_p2), %vm263_vm0, %v1076_v1  ;;  %1003 = vmatpush3.bf16.msra.mxu1 (!%p164_p2), %v1077_v3  ;;  %v1083_v33 = vld [vmem:[%s1263_s2 + $0x30] sm:$0xff] (!%p164_p2)   ;;  %v1084_v34 = vld [vmem:[%s1263_s2 + $0x38] sm:$0xff] (!%p164_p2)   ;;  %v1085_v35 = vld [vmem:[%s1264_s3] sm:$0xff] (!%p164_p2)  }
   0x9   : > { %1004 = vmatprep.subr.bf16.mxu1 (!%p164_p2), %v1078_v4  ;;  %v1086_v36 = vld [vmem:[%s1264_s3 + $0x8] sm:$0xff] (!%p164_p2)   ;;  %v1087_v37 = vld [vmem:[%s1264_s3 + $0x10] sm:$0xff] (!%p164_p2)   ;;  %v1088_v38 = vld [vmem:[%s1264_s3 + $0x18] sm:$0xff] (!%p164_p2)  }
   0xa   : > { %v1089_v39 = vld [vmem:[%s1264_s3 + $0x20] sm:$0xff] (!%p164_p2)   ;;  %v1090_v40 = vld [vmem:[%s1264_s3 + $0x28] sm:$0xff] (!%p164_p2)  }
   0xb   : > { %985 = vmatpush3.bf16.msra.mxu0 (!%p164_p2), %v265_v2 }
   0xc   : > { %1005 = vmatpush3.bf16.msra.mxu1 (!%p164_p2), %v1078_v4  ;;  %1034 = vmatprep.subr.bf16.mxu0 (!%p164_p2), %v1085_v35 }
   0xd   : > { %s1267_s21 = smov (!%p190_p3, %s876_s21), 47  ;;  %1006 = vmatprep.subr.bf16.mxu1 %v1079_v5 }
   0xe   : > { %s877_s26 = sshll.u32 %s1267_s21, 3  ;;  %s879_s8 = sshll.u32 %s1267_s21, 2 }
   0xf   : > { %s1152_s29 = scalar_lea.vmem %s1261_s0, %s877_s26  ;;  %s1224_s11 = scalar_lea.vmem %s1265_s4, %s879_s8 }
  0x10   : > { %v202_v6 = vld [vmem:[%s1152_s29] sm:$0xff]  ;;  %v203_v7 = vld [vmem:[%s1152_s29 + $0x8] sm:$0xff]  ;;  %v204_v8 = vld [vmem:[%s1152_s29 + $0x10] sm:$0xff]  ;;  %1007 = vmatpush3.bf16.msra.mxu1 %v1079_v5 }
  0x11   : > { %v221_v9 = vpack.c.bf16 %v203_v7, %v202_v6  ;;  %v205_v10 = vld [vmem:[%s1152_s29 + $0x18] sm:$0xff]  ;;  %v206_v11 = vld [vmem:[%s1152_s29 + $0x20] sm:$0xff]  ;;  %v207_v12 = vld [vmem:[%s1152_s29 + $0x28] sm:$0xff]  ;;  %1008 = vmatprep.subr.bf16.mxu1 %v1080_v15 }
  0x12   : > { %v222_v13 = vpack.c.bf16 %v205_v10, %v204_v8  ;;  %v223_v14 = vpack.c.bf16 %v207_v12, %v206_v11  ;;  %v208_v16 = vld [vmem:[%s1152_s29 + $0x30] sm:$0xff]  ;;  %v209_v17 = vld [vmem:[%s1152_s29 + $0x38] sm:$0xff]  ;;  %v210_v18 = vld [vmem:[%s1152_s29 + $0x40] sm:$0xff] }
  0x13   : > { %986 = vmatprep.mubr.msk.bf16.mxu0 %vm238_vm1, %v221_v9  ;;  %v211_v19 = vld [vmem:[%s1152_s29 + $0x48] sm:$0xff]  ;;  %v224_v21 = vpack.c.bf16 %v209_v17, %v208_v16  ;;  %v212_v24 = vld [vmem:[%s1152_s29 + $0x50] sm:$0xff]  ;;  %v213_v25 = vld [vmem:[%s1152_s29 + $0x58] sm:$0xff] }
  0x14   : > { %987 = vmatmul.mubr.msk.bf16.vlgmr.msra.gmra.mrb[0].mxu0 %vm238_vm1, %v222_v13  ;;  %v225_v22 = vpack.c.bf16 %v211_v19, %v210_v18  ;;  %1009 = vmatpush3.bf16.msra.mxu1 %v1080_v15  ;;  %v214_v26 = vld [vmem:[%s1152_s29 + $0x60] sm:$0xff]  ;;  %v215_v27 = vld [vmem:[%s1152_s29 + $0x68] sm:$0xff]  ;;  %v226_v28 = vpack.c.bf16 %v213_v25, %v212_v24  ;;  %v216_v30 = vld [vmem:[%s1152_s29 + $0x70] sm:$0xff] }
  0x15   : > { %990 = vmatprep.mubr.msk.bf16.mxu0 %vm238_vm1, %v223_v14  ;;  %1010 = vmatprep.subr.bf16.mxu1 %v1081_v20  ;;  %v227_v29 = vpack.c.bf16 %v215_v27, %v214_v26  ;;  %v217_v31 = vld [vmem:[%s1152_s29 + $0x78] sm:$0xff]  ;;  %v1091_v17 = vld [vmem:[%s1264_s3 + $0x30] sm:$0xff]  }
  0x16   : > { %v228_v32 = vpack.c.bf16 %v217_v31, %v216_v30  ;;  %1035 = vmatpush3.bf16.msra.mxu0 %v1085_v35  ;;  %v1092_v18 = vld [vmem:[%s1264_s3 + $0x38] sm:$0xff]  }
  0x17   : > { %1036 = vmatprep.subr.bf16.mxu0 %v1086_v36 }
  0x18   : > { %1011 = vmatpush3.bf16.msra.mxu1 %v1081_v20 }
  0x19   : > { %1012 = vmatprep.subr.bf16.mxu1 %v1082_v23 }
  0x1a   : > { %1037 = vmatpush3.bf16.msra.mxu0 %v1086_v36 }
  0x1b   : > { %1038 = vmatprep.subr.bf16.mxu0 %v1087_v37 }
  0x1c   : > { %991 = vmatmul.mubr.msk.bf16.gmra.mrb[4].mxu0 %vm238_vm1, %v224_v21  ;;  %1013 = vmatpush3.bf16.msra.mxu1 %v1082_v23 }
  0x1d   : > { %994 = vmatprep.mubr.msk.bf16.mxu0 %vm238_vm1, %v225_v22  ;;  %1014 = vmatprep.subr.bf16.mxu1 %v1083_v33 }
  0x1e   : > { %1039 = vmatpush3.bf16.msra.mxu0 %v1087_v37 }
  0x1f   : > { %1040 = vmatprep.subr.bf16.mxu0 %v1088_v38 }
  0x20   : > { %1015 = vmatpush3.bf16.msra.mxu1 %v1083_v33 }
  0x21   : > { %1016 = vmatprep.subr.bf16.mxu1 %v1084_v34 }
  0x22   : > { %1041 = vmatpush3.bf16.msra.mxu0 %v1088_v38 }
  0x23   : > { %1042 = vmatprep.subr.bf16.mxu0 %v1089_v39 }
  0x24   : > { %995 = vmatmul.mubr.msk.bf16.gmra.mrb[8].mxu0 %vm238_vm1, %v226_v28  ;;  %1017 = vmatpush3.bf16.msra.mxu1 %v1084_v34 }
  0x25   : > { %998 = vmatprep.mubr.msk.bf16.mxu0 %vm238_vm1, %v227_v29 }
  0x26   : > { %1043 = vmatpush3.bf16.msra.mxu0 %v1089_v39 }
  0x27   : > { %1044 = vmatprep.subr.bf16.mxu0 %v1090_v40 }
  0x2a   : > { %1045 = vmatpush3.bf16.msra.mxu0 %v1090_v40 }
  0x2b   : > { %1046 = vmatprep.subr.bf16.mxu0 %v1091_v17 }
  0x2c   : > { %999 = vmatmul.mubr.msk.bf16.gmra.mrb[12].mxu0 %vm238_vm1, %v228_v32 }
  0x2e   : > { %1047 = vmatpush3.bf16.msra.mxu0 %v1091_v17 }
  0x2f   : > { %1048 = vmatprep.subr.bf16.mxu0 %v1092_v18 }
  0x32   : > { %1049 = vmatpush3.bf16.msra.mxu0 %v1092_v18 }
  0xe7   : > { %v988_v41 = vpop.f32.mrb[0].mxu0 }
  0xe8   : > { %v301_v42 = vpop.f32.mrb[1].mxu0  ;;  %v366_v44 = vmax.f32 %v988_v41, 0.0 }
  0xe9   : > { %v989_v43 = vpop.f32.mrb[2].mxu0  ;;  %v364_v47 = vmax.f32 %v301_v42, 0.0 }
  0xea   : > { %v367_v45 = vmax.f32 %v989_v43, 0.0  ;;  %v304_v46 = vpop.f32.mrb[3].mxu0 }
  0xeb   : > { %v365_v48 = vmax.f32 %v304_v46, 0.0 }
  0xec   : > { %v397_v49 = vpack.c.bf16 %v367_v45, %v366_v44 }
  0xed   : > { %v396_v50 = vpack.c.bf16 %v365_v48, %v364_v47 }
  0xef   : > { %v992_v51 = vpop.f32.mrb[4].mxu0  ;;  %1018 = vmatprep.mubr.bf16.mxu1 %v396_v50 }
  0xf0   : > { %v317_v52 = vpop.f32.mrb[5].mxu0  ;;  %1019 = vmatmul.mubr.bf16.vlgmr.msra.gmra.mrb[0].mxu1 %v397_v49  ;;  %v370_v54 = vmax.f32 %v992_v51, 0.0 }
  0xf1   : > { %v993_v53 = vpop.f32.mrb[6].mxu0  ;;  %v368_v57 = vmax.f32 %v317_v52, 0.0 }
  0xf2   : > { %v371_v55 = vmax.f32 %v993_v53, 0.0  ;;  %v320_v56 = vpop.f32.mrb[7].mxu0 }
  0xf3   : > { %v369_v58 = vmax.f32 %v320_v56, 0.0 }
  0xf4   : > { %v399_v59 = vpack.c.bf16 %v371_v55, %v370_v54 }
  0xf5   : > { %v398_v60 = vpack.c.bf16 %v369_v58, %v368_v57 }
  0xf7   : > { %v996_v61 = vpop.f32.mrb[8].mxu0  ;;  %1022 = vmatprep.mubr.bf16.mxu1 %v398_v60 }
  0xf8   : > { %v333_v62 = vpop.f32.mrb[9].mxu0  ;;  %1023 = vmatmul.mubr.bf16.gmra.mrb[4].mxu1 %v399_v59  ;;  %v374_v0 = vmax.f32 %v996_v61, 0.0 }
  0xf9   : > { %v997_v63 = vpop.f32.mrb[10].mxu0  ;;  %v372_v3 = vmax.f32 %v333_v62, 0.0 }
  0xfa   : > { %v375_v1 = vmax.f32 %v997_v63, 0.0  ;;  %v336_v2 = vpop.f32.mrb[11].mxu0 }
  0xfb   : > { %v373_v4 = vmax.f32 %v336_v2, 0.0 }
  0xfc   : > { %v401_v5 = vpack.c.bf16 %v375_v1, %v374_v0 }
  0xfd   : > { %v400_v6 = vpack.c.bf16 %v373_v4, %v372_v3 }
  0xff   : > { %v1000_v7 = vpop.f32.mrb[12].mxu0  ;;  %1026 = vmatprep.mubr.bf16.mxu1 %v400_v6 }
 0x100   : > { %v349_v8 = vpop.f32.mrb[13].mxu0  ;;  %1027 = vmatmul.mubr.bf16.gmra.mrb[8].mxu1 %v401_v5  ;;  %v378_v10 = vmax.f32 %v1000_v7, 0.0 }
 0x101   : > { %v1001_v9 = vpop.f32.mrb[14].mxu0  ;;  %v376_v13 = vmax.f32 %v349_v8, 0.0 }
 0x102   : > { %v379_v11 = vmax.f32 %v1001_v9, 0.0  ;;  %v352_v12 = vpop.f32.mrb[15].mxu0 }
 0x103   : > { %v377_v14 = vmax.f32 %v352_v12, 0.0 }
 0x104   : > { %v403_v15 = vpack.c.bf16 %v379_v11, %v378_v10 }
 0x105   : > { %v402_v16 = vpack.c.bf16 %v377_v14, %v376_v13 }
 0x107   : > { %1030 = vmatprep.mubr.bf16.mxu1 %v402_v16 }
 0x108   : > { %1031 = vmatmul.mubr.bf16.gmra.mrb[12].mxu1 %v403_v15 }
 0x1c3   : > { %v1020_v19 = vpop.f32.mrb[0].mxu1 }
 0x1c4   : > { %v486_v20 = vpop.f32.mrb[1].mxu1  ;;  %v551_v22 = vmax.f32 %v1020_v19, 0.0 }
 0x1c5   : > { %v1021_v21 = vpop.f32.mrb[2].mxu1  ;;  %v549_v25 = vmax.f32 %v486_v20, 0.0 }
 0x1c6   : > { %v552_v23 = vmax.f32 %v1021_v21, 0.0  ;;  %v489_v24 = vpop.f32.mrb[3].mxu1 }
 0x1c7   : > { %v550_v26 = vmax.f32 %v489_v24, 0.0 }
 0x1c8   : > { %v582_v27 = vpack.c.bf16 %v552_v23, %v551_v22 }
 0x1c9   : > { %v581_v28 = vpack.c.bf16 %v550_v26, %v549_v25 }
 0x1cb   : > { %v1024_v29 = vpop.f32.mrb[4].mxu1  ;;  %1050 = vmatprep.mubr.bf16.mxu0 %v581_v28 }
 0x1cc   : > { %v502_v30 = vpop.f32.mrb[5].mxu1  ;;  %1051 = vmatmul.mubr.bf16.vlgmr.msra.gmra.mrb[16].mxu0 %v582_v27  ;;  %v555_v32 = vmax.f32 %v1024_v29, 0.0 }
 0x1cd   : > { %v1025_v31 = vpop.f32.mrb[6].mxu1  ;;  %v553_v35 = vmax.f32 %v502_v30, 0.0 }
 0x1ce   : > { %v556_v33 = vmax.f32 %v1025_v31, 0.0  ;;  %v505_v34 = vpop.f32.mrb[7].mxu1 }
 0x1cf   : > { %v554_v36 = vmax.f32 %v505_v34, 0.0 }
 0x1d0   : > { %v584_v37 = vpack.c.bf16 %v556_v33, %v555_v32 }
 0x1d1   : > { %v583_v38 = vpack.c.bf16 %v554_v36, %v553_v35 }
 0x1d3   : > { %v1028_v39 = vpop.f32.mrb[8].mxu1  ;;  %1054 = vmatprep.mubr.bf16.mxu0 %v583_v38 }
 0x1d4   : > { %v518_v40 = vpop.f32.mrb[9].mxu1  ;;  %1055 = vmatmul.mubr.bf16.gmra.mrb[20].mxu0 %v584_v37  ;;  %v559_v42 = vmax.f32 %v1028_v39, 0.0 }
 0x1d5   : > { %v1029_v41 = vpop.f32.mrb[10].mxu1  ;;  %v557_v45 = vmax.f32 %v518_v40, 0.0 }
 0x1d6   : > { %v560_v43 = vmax.f32 %v1029_v41, 0.0  ;;  %v521_v44 = vpop.f32.mrb[11].mxu1 }
 0x1d7   : > { %v558_v46 = vmax.f32 %v521_v44, 0.0 }
 0x1d8   : > { %v586_v47 = vpack.c.bf16 %v560_v43, %v559_v42 }
 0x1d9   : > { %v585_v48 = vpack.c.bf16 %v558_v46, %v557_v45 }
 0x1db   : > { %v1032_v49 = vpop.f32.mrb[12].mxu1  ;;  %1058 = vmatprep.mubr.bf16.mxu0 %v585_v48 }
 0x1dc   : > { %v534_v50 = vpop.f32.mrb[13].mxu1  ;;  %1059 = vmatmul.mubr.bf16.gmra.mrb[24].mxu0 %v586_v47  ;;  %v563_v52 = vmax.f32 %v1032_v49, 0.0 }
 0x1dd   : > { %v1033_v51 = vpop.f32.mrb[14].mxu1  ;;  %v561_v55 = vmax.f32 %v534_v50, 0.0 }
 0x1de   : > { %v564_v53 = vmax.f32 %v1033_v51, 0.0  ;;  %v537_v54 = vpop.f32.mrb[15].mxu1 }
 0x1df   : > { %v562_v56 = vmax.f32 %v537_v54, 0.0 }
 0x1e0   : > { %v588_v57 = vpack.c.bf16 %v564_v53, %v563_v52 }
 0x1e1   : > { %v587_v58 = vpack.c.bf16 %v562_v56, %v561_v55 }
 0x1e3   : > { %1062 = vmatprep.mubr.bf16.mxu0 %v587_v58 }
 0x1e4   : > { %1063 = vmatmul.mubr.bf16.gmra.mrb[28].mxu0 %v588_v57 }
 0x29f   : > { %v1052_v59 = vpop.f32.mrb[16].mxu0 }
 0x2a0   : > { %v926_v60 = vpack.c.bf16 %v1052_v59, %v1052_v59  ;;  %v671_v61 = vpop.f32.mrb[17].mxu0 }
 0x2a1   : > { %v924_v62 = vpack.c.bf16 %v671_v61, %v671_v61  ;;  %v1053_v63 = vpop.f32.mrb[18].mxu0 }
 0x2a2   : > { %801 = vst.msk [vmem:[%s1224_s11 + $0x8] sm:$0xf] %vm798_vm2, %v926_v60  ;;  %v927_v0 = vpack.c.bf16 %v1053_v63, %v1053_v63  ;;  %v674_v1 = vpop.f32.mrb[19].mxu0 }
 0x2a3   : > { %799 = vst.msk [vmem:[%s1224_s11] sm:$0xf] %vm798_vm2, %v924_v62  ;;  %v925_v2 = vpack.c.bf16 %v674_v1, %v674_v1 }
 0x2a4   : > { %802 = vst.msk [vmem:[%s1224_s11 + $0xc] sm:$0xf] %vm798_vm2, %v927_v0 }
 0x2a5   : > { %800 = vst.msk [vmem:[%s1224_s11 + $0x4] sm:$0xf] %vm798_vm2, %v925_v2 }
 0x2a7   : > { %v1056_v3 = vpop.f32.mrb[20].mxu0 }
 0x2a8   : > { %v930_v4 = vpack.c.bf16 %v1056_v3, %v1056_v3  ;;  %v687_v5 = vpop.f32.mrb[21].mxu0 }
 0x2a9   : > { %v928_v6 = vpack.c.bf16 %v687_v5, %v687_v5  ;;  %v1057_v7 = vpop.f32.mrb[22].mxu0 }
 0x2aa   : > { %805 = vst.msk [vmem:[%s1224_s11 + $0x18] sm:$0xf] %vm798_vm2, %v930_v4  ;;  %v931_v8 = vpack.c.bf16 %v1057_v7, %v1057_v7  ;;  %v690_v9 = vpop.f32.mrb[23].mxu0 }
 0x2ab   : > { %803 = vst.msk [vmem:[%s1224_s11 + $0x10] sm:$0xf] %vm798_vm2, %v928_v6  ;;  %v929_v10 = vpack.c.bf16 %v690_v9, %v690_v9 }
 0x2ac   : > { %806 = vst.msk [vmem:[%s1224_s11 + $0x1c] sm:$0xf] %vm798_vm2, %v931_v8 }
 0x2ad   : > { %804 = vst.msk [vmem:[%s1224_s11 + $0x14] sm:$0xf] %vm798_vm2, %v929_v10 }
 0x2af   : > { %v1060_v11 = vpop.f32.mrb[24].mxu0 }
 0x2b0   : > { %v934_v12 = vpack.c.bf16 %v1060_v11, %v1060_v11  ;;  %v703_v13 = vpop.f32.mrb[25].mxu0 }
 0x2b1   : > { %v932_v14 = vpack.c.bf16 %v703_v13, %v703_v13  ;;  %v1061_v15 = vpop.f32.mrb[26].mxu0 }
 0x2b2   : > { %809 = vst.msk [vmem:[%s1224_s11 + $0x28] sm:$0xf] %vm798_vm2, %v934_v12  ;;  %v935_v16 = vpack.c.bf16 %v1061_v15, %v1061_v15  ;;  %v706_v17 = vpop.f32.mrb[27].mxu0 }
 0x2b3   : > { %807 = vst.msk [vmem:[%s1224_s11 + $0x20] sm:$0xf] %vm798_vm2, %v932_v14  ;;  %v933_v18 = vpack.c.bf16 %v706_v17, %v706_v17 }
 0x2b4   : > { %810 = vst.msk [vmem:[%s1224_s11 + $0x2c] sm:$0xf] %vm798_vm2, %v935_v16 }
 0x2b5   : > { %808 = vst.msk [vmem:[%s1224_s11 + $0x24] sm:$0xf] %vm798_vm2, %v933_v18 }
 0x2b7   : > { %v1064_v19 = vpop.f32.mrb[28].mxu0 }
 0x2b8   : > { %v938_v20 = vpack.c.bf16 %v1064_v19, %v1064_v19  ;;  %v719_v21 = vpop.f32.mrb[29].mxu0 }
 0x2b9   : > { %v936_v22 = vpack.c.bf16 %v719_v21, %v719_v21  ;;  %v1065_v23 = vpop.f32.mrb[30].mxu0 }
 0x2ba   : > { %813 = vst.msk [vmem:[%s1224_s11 + $0x38] sm:$0xf] %vm798_vm2, %v938_v20  ;;  %v939_v24 = vpack.c.bf16 %v1065_v23, %v1065_v23  ;;  %v722_v25 = vpop.f32.mrb[31].mxu0 }
 0x2bb   : > { %811 = vst.msk [vmem:[%s1224_s11 + $0x30] sm:$0xf] %vm798_vm2, %v936_v22  ;;  %v937_v26 = vpack.c.bf16 %v722_v25, %v722_v25 }
 0x2bc   : > { %814 = vst.msk [vmem:[%s1224_s11 + $0x3c] sm:$0xf] %vm798_vm2, %v939_v24 }
 0x2bd   : > { %812 = vst.msk [vmem:[%s1224_s11 + $0x34] sm:$0xf] %vm798_vm2, %v937_v26 }
 0x2be PF: > { %s14_s15 = sadd.s32 1, %s1099_s15  }
 0x2bf   : > { %p11_p4 = scmp.ge.s32.totalorder %s14_s15, 5  }
 0x2c1   :  { %13 = sbr.rel (!%p11_p4) target bundleno = 1 (0x1), region = 66 }

</bundles_post_ra>
